<compile_context>
chip_gen: v7x
topology: tpu7x:2x2x1
jax: 0.10.0
libtpu: 0.0.40
codegen_flags: <defaults>
</compile_context>

<pallas_src>
import functools
import math

import jax
import jax.numpy as jnp
from jax.experimental import pallas as pl
from jax.experimental.pallas import tpu as pltpu


def dgg_kernel(x_ref, dft_ref, wx_ref, etddw_ref, wd2a_ref, wd2b_ref,
               mask_ref, sel_ref, wxabs_ref, o_ref, *, topk):
    B, N, _ = o_ref.shape
    fft_dim, E = wx_ref.shape
    BN = B * N

    xb = x_ref[...]                                                  # (BN, T)

    # 1) |rfft| via ONE fused [cos | sin] DFT matmul: (BN, T) @ (T, 2F)
    ri = jnp.dot(xb, dft_ref[...], preferred_element_type=jnp.float32)
    re = ri[:, :fft_dim]
    im = ri[:, fft_dim:]
    mag2 = re * re + im * im                                         # (BN, F)
    mag = jnp.sqrt(mag2)

    # 2) F.normalize(p=2, dim=fft) then F.normalize(p=2, dim=node), eps=1e-12.
    #    rsqrt(max(ss, eps^2)) == 1 / max(||x||, eps) and runs on the EUP.
    ss_f = jnp.sum(mag2, axis=1, keepdims=True)                      # (BN, 1)
    xn = mag * jax.lax.rsqrt(jnp.maximum(ss_f, 1e-24))
    xn3 = xn.reshape(B, N, fft_dim)
    ss_n = jnp.sum(xn3 * xn3, axis=1, keepdims=True)                 # (B, 1, F)
    xn3 = xn3 * jax.lax.rsqrt(jnp.maximum(ss_n, 1e-24))
    xn = xn3.reshape(BN, fft_dim)

    # 3) frequency-domain embedding: (BN, F) @ (F, E) -> (BN, E)
    x_emb = jnp.dot(xn, wx_ref[...], preferred_element_type=jnp.float32)

    # 4) per-node Wd contraction, block-diagonal MXU form (no in-kernel concat):
    #    prod[bn, m*E+e] = sum_f [x_emb | E | T_D | D_W][bn,f] * Wd[m,f,e]
    #    keep only m == row's node (diag_mask), compress with the selection
    #    matmul -> x1[bn, e] = sum_f xedw[bn,f] * Wd[n,f,e].
    prod = (jnp.dot(x_emb, wd2a_ref[...], preferred_element_type=jnp.float32) +
            jnp.dot(etddw_ref[...], wd2b_ref[...],
                    preferred_element_type=jnp.float32))             # (BN, N*E)
    x1 = jnp.dot(prod * mask_ref[...], sel_ref[...],
                 preferred_element_type=jnp.float32)                 # (BN, E)
    x1 = jnp.maximum(x1, 0.0)                                        # ReLU

    # 5) per-batch LayerNorm over [nodes, embed] jointly (eps=1e-8, no affine);
    #    Dropout(p=0.1) is identity in eval mode.
    x1_3 = x1.reshape(B, N, E)
    cnt = float(N * E)
    mu = jnp.sum(jnp.sum(x1_3, axis=2, keepdims=True), axis=1, keepdims=True) / cnt
    xc = x1_3 - mu
    var = jnp.sum(jnp.sum(xc * xc, axis=2, keepdims=True), axis=1, keepdims=True) / cnt
    x1k = (xc * jax.lax.rsqrt(var + 1e-8)).reshape(BN, E)
    dew = jnp.dot(x1k, wxabs_ref[...], preferred_element_type=jnp.float32)   # (BN, E)

    # 6) adjacency per batch: adj[b] = DEw[b] @ x1[b]^T, ReLU, top-k, softmax
    adj = jnp.einsum('bne,bme->bnm', dew.reshape(B, N, E), x1_3,
                     preferred_element_type=jnp.float32)             # (B, N, N)
    adp = jnp.maximum(adj, 0.0)

    if topk > 0:
        # k-th largest per row via iterative max extraction (static unroll).
        # TODO(synk): torch adds rand_like(adp)*0.01 tie-break noise before
        # topk; with duplicate positive values this mask can keep >k entries.
        # Ties here only occur among exactly-equal post-ReLU zeros, where the
        # masked product is unchanged, so the noise is omitted for determinism.
        work = adp
        kth = None
        for _ in range(topk):
            kth = jnp.max(work, axis=-1, keepdims=True)              # (B, N, 1)
            work = jnp.where(work >= kth, -1e30, work)
        adp = jnp.where(adp >= kth, adp, 0.0)                        # adj * mask

    m = jnp.max(adp, axis=-1, keepdims=True)
    ex = jnp.exp(adp - m)
    # approx reciprocal -> rows sum to 1 within ~2^-12 relative error.
    p = ex * pl.reciprocal(jnp.sum(ex, axis=-1, keepdims=True), approx=True)
    o_ref[...] = p.astype(o_ref.dtype)


def dynamic_graph_generator(x, t_d, d_w, e_emb, params, *, topk):
    """x: (B, T, N); t_d, d_w: (B, N, embed); e_emb: (N, embed) -> (B, N, N)."""
    B, T, N = x.shape
    E = e_emb.shape[1]
    fft_dim = T // 2 + 1
    BN = B * N

    # Fused [cos | sin] real-DFT basis (trace-time constant): (T, 2F).
    t_idx = jnp.arange(T, dtype=jnp.float32)[:, None]
    f_idx = jnp.arange(fft_dim, dtype=jnp.float32)[None, :]
    ang = -2.0 * jnp.pi * t_idx * f_idx / float(T)
    dft = jnp.concatenate([jnp.cos(ang), jnp.sin(ang)], axis=1)      # (T, 2F)

    # Fold B into the matmul M dimension: (B, T, N) -> (B*N, T).
    x2d = jnp.transpose(x, (0, 2, 1)).reshape(BN, T)

    # Pre-concatenate the static features [E | T_D | D_W] (layout plumbing,
    # no compute hoisted): (B*N, 3E).
    e_b = jnp.broadcast_to(e_emb[None], (B, N, E))
    etddw = jnp.concatenate([e_b, t_d, d_w], axis=-1).reshape(BN, 3 * E)

    # Wd (N, 4E, E) -> (4E, N*E) so the per-node contraction becomes one
    # lane-dense MXU matmul; split into x_emb rows and static-feature rows.
    wd2 = jnp.transpose(params['Wd'], (1, 0, 2)).reshape(4 * E, N * E)
    wd2a = wd2[:E]                                                   # (E,  N*E)
    wd2b = wd2[E:]                                                   # (3E, N*E)

    # Block-diagonal extraction mask (B*N, N*E) and selection matrix (N*E, E).
    row_n = jnp.tile(jnp.arange(N), B)                               # (BN,)
    col_n = jnp.repeat(jnp.arange(N), E)                             # (N*E,)
    diag_mask = (row_n[:, None] == col_n[None, :]).astype(jnp.float32)
    col_e = jnp.tile(jnp.arange(E), N)                               # (N*E,)
    sel = (col_e[:, None] == jnp.arange(E)[None, :]).astype(jnp.float32)

    kernel = functools.partial(dgg_kernel, topk=topk)
    c2 = lambda i: (0, 0)
    c3 = lambda i: (0, 0, 0)

    out = pl.pallas_call(
        kernel,
        out_shape=jax.ShapeDtypeStruct((B, N, N), jnp.float32),
        grid_spec=pltpu.PrefetchScalarGridSpec(
            num_scalar_prefetch=0,
            grid=(1,),                                  # single step, no per-batch overhead
            in_specs=[
                pl.BlockSpec((BN, T), c2),              # x folded (B*N, T)
                pl.BlockSpec((T, 2 * fft_dim), c2),     # DFT basis
                pl.BlockSpec((fft_dim, E), c2),         # Wx
                pl.BlockSpec((BN, 3 * E), c2),          # [E | T_D | D_W]
                pl.BlockSpec((E, N * E), c2),           # Wd rows for x_emb
                pl.BlockSpec((3 * E, N * E), c2),       # Wd rows for static feats
                pl.BlockSpec((BN, N * E), c2),          # block-diagonal mask
                pl.BlockSpec((N * E, E), c2),           # selection matrix
                pl.BlockSpec((E, E), c2),               # Wxabs
            ],
            out_specs=pl.BlockSpec((B, N, N), c3),
        ),
        compiler_params=pltpu.CompilerParams(dimension_semantics=("arbitrary",)),
    )(x2d, dft, params['Wx'], etddw, wd2a, wd2b, diag_mask, sel, params['Wxabs'])
    return out


def reference(x, t_d, d_w, e_emb, params, topk):
    """Pure-JAX mirror of the PyTorch forward (eval mode) for validation."""
    B = x.shape[0]
    xn1 = jnp.abs(jnp.fft.rfft(x, axis=1))                           # (B, F, N)
    xn1 = xn1 / jnp.maximum(jnp.linalg.norm(xn1, axis=1, keepdims=True), 1e-12)
    xn1 = xn1 / jnp.maximum(jnp.linalg.norm(xn1, axis=2, keepdims=True), 1e-12)
    xb = jnp.einsum('bfn,fd->bnd', xn1, params['Wx'])                # (B, N, E)
    xe = jnp.concatenate([xb, jnp.broadcast_to(e_emb, (B,) + e_emb.shape)], axis=2)
    xedw = jnp.concatenate([xe, t_d, d_w], axis=2)                   # (B, N, 4E)
    x1 = jax.nn.relu(jnp.einsum('bnf,nfe->bne', xedw, params['Wd']))
    mu = jnp.mean(x1, axis=(1, 2), keepdims=True)
    var = jnp.mean((x1 - mu) ** 2, axis=(1, 2), keepdims=True)
    x1k = (x1 - mu) / jnp.sqrt(var + 1e-8)
    dew = jnp.einsum('bne,ek->bnk', x1k, params['Wxabs'])
    adp = jax.nn.relu(jnp.einsum('bnk,bmk->bnm', dew, x1))
    if topk > 0:
        kth = jax.lax.top_k(adp, topk)[0][..., -1:]
        adp = jnp.where(adp >= kth, adp, 0.0)
    return jax.nn.softmax(adp, axis=2)


def _xavier(key, shape):
    if len(shape) == 2:
        fan_in, fan_out = shape
    else:
        recept = 1
        for s in shape[2:]:
            recept *= s
        fan_in, fan_out = shape[1] * recept, shape[0] * recept
    bound = math.sqrt(6.0 / (fan_in + fan_out))
    return jax.random.uniform(key, shape, jnp.float32, -bound, bound)


if __name__ == "__main__":
    B, in_steps, nodes, embed_dim, c = 2, 12, 16, 8, 2
    topk = int(c * math.log(nodes, 2))                               # c * log2(nodes)
    fft_dim = in_steps // 2 + 1

    key = jax.random.PRNGKey(0)
    ks = jax.random.split(key, 7)
    x = jax.random.normal(ks[0], (B, in_steps, nodes), jnp.float32)
    t_d = jax.random.normal(ks[1], (B, nodes, embed_dim), jnp.float32)
    d_w = jax.random.normal(ks[2], (B, nodes, embed_dim), jnp.float32)
    e_emb = jax.random.normal(ks[3], (nodes, embed_dim), jnp.float32)
    params = dict(
        Wx=_xavier(ks[4], (fft_dim, embed_dim)),
        Wd=_xavier(ks[5], (nodes, 4 * embed_dim, embed_dim)),
        Wxabs=_xavier(ks[6], (embed_dim, embed_dim)),
    )

    out = dynamic_graph_generator(x, t_d, d_w, e_emb, params, topk=topk)
    out = jax.block_until_ready(out)

    ref = jax.block_until_ready(reference(x, t_d, d_w, e_emb, params, topk))
    assert out.shape == (B, nodes, nodes)
    max_err = float(jnp.max(jnp.abs(out - ref)))
    assert max_err < 1e-2, f"mismatch vs reference: {max_err}"

    print("KERNEL_OK")
</pallas_src>

<mosaic_0001>
module attributes {stable_mosaic.version = 11 : i64} {
  func.func @dgg_kernel(%arg0: i32, %arg1: memref<32x12xf32, #tpu.memory_space<vmem>>, %arg2: memref<12x14xf32, #tpu.memory_space<vmem>>, %arg3: memref<7x8xf32, #tpu.memory_space<vmem>>, %arg4: memref<32x24xf32, #tpu.memory_space<vmem>>, %arg5: memref<8x128xf32, #tpu.memory_space<vmem>>, %arg6: memref<24x128xf32, #tpu.memory_space<vmem>>, %arg7: memref<32x128xf32, #tpu.memory_space<vmem>>, %arg8: memref<128x8xf32, #tpu.memory_space<vmem>>, %arg9: memref<8x8xf32, #tpu.memory_space<vmem>>, %arg10: memref<2x16x16xf32, #tpu.memory_space<vmem>>) attributes {dimension_semantics = [#tpu.dimension_semantics<arbitrary>], iteration_bounds = array<i64: 1>, scalar_prefetch = 0 : i64, scratch_operands = 0 : i64, tpu.core_type = #tpu.core_type<tc>, window_params = [{pipeline_mode = #tpu.pipeline_mode<synchronous>, transform_indices = @transform_0, window_bounds = array<i64: 32, 12>}, {pipeline_mode = #tpu.pipeline_mode<synchronous>, transform_indices = @transform_1, window_bounds = array<i64: 12, 14>}, {pipeline_mode = #tpu.pipeline_mode<synchronous>, transform_indices = @transform_2, window_bounds = array<i64: 7, 8>}, {pipeline_mode = #tpu.pipeline_mode<synchronous>, transform_indices = @transform_3, window_bounds = array<i64: 32, 24>}, {pipeline_mode = #tpu.pipeline_mode<synchronous>, transform_indices = @transform_4, window_bounds = array<i64: 8, 128>}, {pipeline_mode = #tpu.pipeline_mode<synchronous>, transform_indices = @transform_5, window_bounds = array<i64: 24, 128>}, {pipeline_mode = #tpu.pipeline_mode<synchronous>, transform_indices = @transform_6, window_bounds = array<i64: 32, 128>}, {pipeline_mode = #tpu.pipeline_mode<synchronous>, transform_indices = @transform_7, window_bounds = array<i64: 128, 8>}, {pipeline_mode = #tpu.pipeline_mode<synchronous>, transform_indices = @transform_8, window_bounds = array<i64: 8, 8>}, {pipeline_mode = #tpu.pipeline_mode<synchronous>, transform_indices = @transform_9, window_bounds = array<i64: 2, 16, 16>}]} {
    %c0 = arith.constant 0 : index
    %c0_0 = arith.constant 0 : index
    %0 = vector.load %arg1[%c0, %c0_0] : memref<32x12xf32, #tpu.memory_space<vmem>>, vector<32x12xf32>
    %c0_1 = arith.constant 0 : index
    %c0_2 = arith.constant 0 : index
    %1 = vector.load %arg2[%c0_1, %c0_2] : memref<12x14xf32, #tpu.memory_space<vmem>>, vector<12x14xf32>
    %cst = arith.constant dense<0.000000e+00> : vector<32x14xf32>
    %2 = tpu.matmul %0, %1, %cst {dimension_numbers = #tpu.dot_dimension_numbers<[1], [0], [0], [1], [0, 0, 1, 1], [], []>} : vector<32x12xf32>, vector<12x14xf32>, vector<32x14xf32> -> vector<32x14xf32>
    %3 = vector.extract_strided_slice %2 {offsets = [0, 0], sizes = [32, 7], strides = [1, 1]} : vector<32x14xf32> to vector<32x7xf32>
    %4 = vector.extract_strided_slice %2 {offsets = [0, 7], sizes = [32, 7], strides = [1, 1]} : vector<32x14xf32> to vector<32x7xf32>
    %5 = arith.mulf %3, %3 : vector<32x7xf32>
    %6 = arith.mulf %4, %4 : vector<32x7xf32>
    %7 = arith.addf %5, %6 : vector<32x7xf32>
    %8 = math.sqrt %7 : vector<32x7xf32>
    %cst_3 = arith.constant dense<0.000000e+00> : vector<32xf32>
    %9 = vector.multi_reduction <add>, %7, %cst_3 [1] : vector<32x7xf32> to vector<32xf32>
    %10 = vector.shape_cast %9 : vector<32xf32> to vector<32x1xf32>
    %cst_4 = arith.constant 1.000000e-24 : f32
    %11 = vector.broadcast %cst_4 : f32 to vector<32x1xf32>
    %12 = arith.maximumf %10, %11 : vector<32x1xf32>
    %13 = math.rsqrt %12 : vector<32x1xf32>
    %14 = vector.broadcast %13 : vector<32x1xf32> to vector<32x7xf32>
    %15 = arith.mulf %8, %14 : vector<32x7xf32>
    %16 = vector.shape_cast %15 : vector<32x7xf32> to vector<2x16x7xf32>
    %17 = arith.mulf %16, %16 : vector<2x16x7xf32>
    %cst_5 = arith.constant dense<0.000000e+00> : vector<2x7xf32>
    %18 = vector.multi_reduction <add>, %17, %cst_5 [1] : vector<2x16x7xf32> to vector<2x7xf32>
    %19 = vector.shape_cast %18 : vector<2x7xf32> to vector<2x1x7xf32>
    %cst_6 = arith.constant 1.000000e-24 : f32
    %20 = vector.broadcast %cst_6 : f32 to vector<2x1x7xf32>
    %21 = arith.maximumf %19, %20 : vector<2x1x7xf32>
    %22 = math.rsqrt %21 : vector<2x1x7xf32>
    %23 = vector.broadcast %22 : vector<2x1x7xf32> to vector<2x16x7xf32>
    %24 = arith.mulf %16, %23 : vector<2x16x7xf32>
    %25 = vector.shape_cast %24 : vector<2x16x7xf32> to vector<32x7xf32>
    %c0_7 = arith.constant 0 : index
    %c0_8 = arith.constant 0 : index
    %26 = vector.load %arg3[%c0_7, %c0_8] : memref<7x8xf32, #tpu.memory_space<vmem>>, vector<7x8xf32>
    %cst_9 = arith.constant dense<0.000000e+00> : vector<32x8xf32>
    %27 = tpu.matmul %25, %26, %cst_9 {dimension_numbers = #tpu.dot_dimension_numbers<[1], [0], [0], [1], [0, 0, 1, 1], [], []>} : vector<32x7xf32>, vector<7x8xf32>, vector<32x8xf32> -> vector<32x8xf32>
    %c0_10 = arith.constant 0 : index
    %c0_11 = arith.constant 0 : index
    %28 = vector.load %arg5[%c0_10, %c0_11] : memref<8x128xf32, #tpu.memory_space<vmem>>, vector<8x128xf32>
    %cst_12 = arith.constant dense<0.000000e+00> : vector<32x128xf32>
    %29 = tpu.matmul %27, %28, %cst_12 {dimension_numbers = #tpu.dot_dimension_numbers<[1], [0], [0], [1], [0, 0, 1, 1], [], []>} : vector<32x8xf32>, vector<8x128xf32>, vector<32x128xf32> -> vector<32x128xf32>
    %c0_13 = arith.constant 0 : index
    %c0_14 = arith.constant 0 : index
    %30 = vector.load %arg4[%c0_13, %c0_14] : memref<32x24xf32, #tpu.memory_space<vmem>>, vector<32x24xf32>
    %c0_15 = arith.constant 0 : index
    %c0_16 = arith.constant 0 : index
    %31 = vector.load %arg6[%c0_15, %c0_16] : memref<24x128xf32, #tpu.memory_space<vmem>>, vector<24x128xf32>
    %cst_17 = arith.constant dense<0.000000e+00> : vector<32x128xf32>
    %32 = tpu.matmul %30, %31, %cst_17 {dimension_numbers = #tpu.dot_dimension_numbers<[1], [0], [0], [1], [0, 0, 1, 1], [], []>} : vector<32x24xf32>, vector<24x128xf32>, vector<32x128xf32> -> vector<32x128xf32>
    %33 = arith.addf %29, %32 : vector<32x128xf32>
    %c0_18 = arith.constant 0 : index
    %c0_19 = arith.constant 0 : index
    %34 = vector.load %arg7[%c0_18, %c0_19] : memref<32x128xf32, #tpu.memory_space<vmem>>, vector<32x128xf32>
    %35 = arith.mulf %33, %34 : vector<32x128xf32>
    %c0_20 = arith.constant 0 : index
    %c0_21 = arith.constant 0 : index
    %36 = vector.load %arg8[%c0_20, %c0_21] : memref<128x8xf32, #tpu.memory_space<vmem>>, vector<128x8xf32>
    %cst_22 = arith.constant dense<0.000000e+00> : vector<32x8xf32>
    %37 = tpu.matmul %35, %36, %cst_22 {dimension_numbers = #tpu.dot_dimension_numbers<[1], [0], [0], [1], [0, 0, 1, 1], [], []>} : vector<32x128xf32>, vector<128x8xf32>, vector<32x8xf32> -> vector<32x8xf32>
    %cst_23 = arith.constant 0.000000e+00 : f32
    %38 = vector.broadcast %cst_23 : f32 to vector<32x8xf32>
    %39 = arith.maximumf %37, %38 : vector<32x8xf32>
    %40 = vector.shape_cast %39 : vector<32x8xf32> to vector<2x16x8xf32>
    %cst_24 = arith.constant dense<0.000000e+00> : vector<2x16xf32>
    %41 = vector.multi_reduction <add>, %40, %cst_24 [2] : vector<2x16x8xf32> to vector<2x16xf32>
    %42 = vector.shape_cast %41 : vector<2x16xf32> to vector<2x16x1xf32>
    %cst_25 = arith.constant dense<0.000000e+00> : vector<2x1xf32>
    %43 = vector.multi_reduction <add>, %42, %cst_25 [1] : vector<2x16x1xf32> to vector<2x1xf32>
    %44 = vector.shape_cast %43 : vector<2x1xf32> to vector<2x1x1xf32>
    %cst_26 = arith.constant 1.280000e+02 : f32
    %45 = vector.broadcast %cst_26 : f32 to vector<2x1x1xf32>
    %46 = arith.divf %44, %45 : vector<2x1x1xf32>
    %47 = vector.broadcast %46 : vector<2x1x1xf32> to vector<2x16x8xf32>
    %48 = arith.subf %40, %47 : vector<2x16x8xf32>
    %49 = arith.mulf %48, %48 : vector<2x16x8xf32>
    %cst_27 = arith.constant dense<0.000000e+00> : vector<2x16xf32>
    %50 = vector.multi_reduction <add>, %49, %cst_27 [2] : vector<2x16x8xf32> to vector<2x16xf32>
    %51 = vector.shape_cast %50 : vector<2x16xf32> to vector<2x16x1xf32>
    %cst_28 = arith.constant dense<0.000000e+00> : vector<2x1xf32>
    %52 = vector.multi_reduction <add>, %51, %cst_28 [1] : vector<2x16x1xf32> to vector<2x1xf32>
    %53 = vector.shape_cast %52 : vector<2x1xf32> to vector<2x1x1xf32>
    %cst_29 = arith.constant 1.280000e+02 : f32
    %54 = vector.broadcast %cst_29 : f32 to vector<2x1x1xf32>
    %55 = arith.divf %53, %54 : vector<2x1x1xf32>
    %cst_30 = arith.constant 9.99999993E-9 : f32
    %56 = vector.broadcast %cst_30 : f32 to vector<2x1x1xf32>
    %57 = arith.addf %55, %56 : vector<2x1x1xf32>
    %58 = math.rsqrt %57 : vector<2x1x1xf32>
    %59 = vector.broadcast %58 : vector<2x1x1xf32> to vector<2x16x8xf32>
    %60 = arith.mulf %48, %59 : vector<2x16x8xf32>
    %61 = vector.shape_cast %60 : vector<2x16x8xf32> to vector<32x8xf32>
    %c0_31 = arith.constant 0 : index
    %c0_32 = arith.constant 0 : index
    %62 = vector.load %arg9[%c0_31, %c0_32] : memref<8x8xf32, #tpu.memory_space<vmem>>, vector<8x8xf32>
    %cst_33 = arith.constant dense<0.000000e+00> : vector<32x8xf32>
    %63 = tpu.matmul %61, %62, %cst_33 {dimension_numbers = #tpu.dot_dimension_numbers<[1], [0], [0], [1], [0, 0, 1, 1], [], []>} : vector<32x8xf32>, vector<8x8xf32>, vector<32x8xf32> -> vector<32x8xf32>
    %64 = vector.shape_cast %63 : vector<32x8xf32> to vector<2x16x8xf32>
    "tpu.trace_start"() <{level = 10 : i32, message = "bne,bme->bnm"}> : () -> ()
    %cst_34 = arith.constant dense<0.000000e+00> : vector<2x16x16xf32>
    %65 = tpu.matmul %64, %40, %cst_34 {dimension_numbers = #tpu.dot_dimension_numbers<[2], [2], [1], [1], [0, 0, 0, 1, 1, 1], [0], [0]>} : vector<2x16x8xf32>, vector<2x16x8xf32>, vector<2x16x16xf32> -> vector<2x16x16xf32>
    "tpu.trace_stop"() : () -> ()
    %cst_35 = arith.constant 0.000000e+00 : f32
    %66 = vector.broadcast %cst_35 : f32 to vector<2x16x16xf32>
    %67 = arith.maximumf %65, %66 : vector<2x16x16xf32>
    %cst_36 = arith.constant dense<0xFF800000> : vector<2x16xf32>
    %68 = vector.multi_reduction <maximumf>, %67, %cst_36 [2] : vector<2x16x16xf32> to vector<2x16xf32>
    %69 = vector.shape_cast %68 : vector<2x16xf32> to vector<2x16x1xf32>
    %70 = vector.broadcast %69 : vector<2x16x1xf32> to vector<2x16x16xf32>
    %71 = arith.cmpf oge, %67, %70 : vector<2x16x16xf32>
    %cst_37 = arith.constant -1.000000e+30 : f32
    %72 = vector.broadcast %cst_37 : f32 to vector<2x16x16xf32>
    %73 = arith.select %71, %72, %67 : vector<2x16x16xi1>, vector<2x16x16xf32>
    %cst_38 = arith.constant dense<0xFF800000> : vector<2x16xf32>
    %74 = vector.multi_reduction <maximumf>, %73, %cst_38 [2] : vector<2x16x16xf32> to vector<2x16xf32>
    %75 = vector.shape_cast %74 : vector<2x16xf32> to vector<2x16x1xf32>
    %76 = vector.broadcast %75 : vector<2x16x1xf32> to vector<2x16x16xf32>
    %77 = arith.cmpf oge, %73, %76 : vector<2x16x16xf32>
    %cst_39 = arith.constant -1.000000e+30 : f32
    %78 = vector.broadcast %cst_39 : f32 to vector<2x16x16xf32>
    %79 = arith.select %77, %78, %73 : vector<2x16x16xi1>, vector<2x16x16xf32>
    %cst_40 = arith.constant dense<0xFF800000> : vector<2x16xf32>
    %80 = vector.multi_reduction <maximumf>, %79, %cst_40 [2] : vector<2x16x16xf32> to vector<2x16xf32>
    %81 = vector.shape_cast %80 : vector<2x16xf32> to vector<2x16x1xf32>
    %82 = vector.broadcast %81 : vector<2x16x1xf32> to vector<2x16x16xf32>
    %83 = arith.cmpf oge, %79, %82 : vector<2x16x16xf32>
    %cst_41 = arith.constant -1.000000e+30 : f32
    %84 = vector.broadcast %cst_41 : f32 to vector<2x16x16xf32>
    %85 = arith.select %83, %84, %79 : vector<2x16x16xi1>, vector<2x16x16xf32>
    %cst_42 = arith.constant dense<0xFF800000> : vector<2x16xf32>
    %86 = vector.multi_reduction <maximumf>, %85, %cst_42 [2] : vector<2x16x16xf32> to vector<2x16xf32>
    %87 = vector.shape_cast %86 : vector<2x16xf32> to vector<2x16x1xf32>
    %88 = vector.broadcast %87 : vector<2x16x1xf32> to vector<2x16x16xf32>
    %89 = arith.cmpf oge, %85, %88 : vector<2x16x16xf32>
    %cst_43 = arith.constant -1.000000e+30 : f32
    %90 = vector.broadcast %cst_43 : f32 to vector<2x16x16xf32>
    %91 = arith.select %89, %90, %85 : vector<2x16x16xi1>, vector<2x16x16xf32>
    %cst_44 = arith.constant dense<0xFF800000> : vector<2x16xf32>
    %92 = vector.multi_reduction <maximumf>, %91, %cst_44 [2] : vector<2x16x16xf32> to vector<2x16xf32>
    %93 = vector.shape_cast %92 : vector<2x16xf32> to vector<2x16x1xf32>
    %94 = vector.broadcast %93 : vector<2x16x1xf32> to vector<2x16x16xf32>
    %95 = arith.cmpf oge, %91, %94 : vector<2x16x16xf32>
    %cst_45 = arith.constant -1.000000e+30 : f32
    %96 = vector.broadcast %cst_45 : f32 to vector<2x16x16xf32>
    %97 = arith.select %95, %96, %91 : vector<2x16x16xi1>, vector<2x16x16xf32>
    %cst_46 = arith.constant dense<0xFF800000> : vector<2x16xf32>
    %98 = vector.multi_reduction <maximumf>, %97, %cst_46 [2] : vector<2x16x16xf32> to vector<2x16xf32>
    %99 = vector.shape_cast %98 : vector<2x16xf32> to vector<2x16x1xf32>
    %100 = vector.broadcast %99 : vector<2x16x1xf32> to vector<2x16x16xf32>
    %101 = arith.cmpf oge, %97, %100 : vector<2x16x16xf32>
    %cst_47 = arith.constant -1.000000e+30 : f32
    %102 = vector.broadcast %cst_47 : f32 to vector<2x16x16xf32>
    %103 = arith.select %101, %102, %97 : vector<2x16x16xi1>, vector<2x16x16xf32>
    %cst_48 = arith.constant dense<0xFF800000> : vector<2x16xf32>
    %104 = vector.multi_reduction <maximumf>, %103, %cst_48 [2] : vector<2x16x16xf32> to vector<2x16xf32>
    %105 = vector.shape_cast %104 : vector<2x16xf32> to vector<2x16x1xf32>
    %106 = vector.broadcast %105 : vector<2x16x1xf32> to vector<2x16x16xf32>
    %107 = arith.cmpf oge, %103, %106 : vector<2x16x16xf32>
    %cst_49 = arith.constant -1.000000e+30 : f32
    %108 = vector.broadcast %cst_49 : f32 to vector<2x16x16xf32>
    %109 = arith.select %107, %108, %103 : vector<2x16x16xi1>, vector<2x16x16xf32>
    %cst_50 = arith.constant dense<0xFF800000> : vector<2x16xf32>
    %110 = vector.multi_reduction <maximumf>, %109, %cst_50 [2] : vector<2x16x16xf32> to vector<2x16xf32>
    %111 = vector.shape_cast %110 : vector<2x16xf32> to vector<2x16x1xf32>
    %112 = vector.broadcast %111 : vector<2x16x1xf32> to vector<2x16x16xf32>
    %113 = arith.cmpf oge, %67, %112 : vector<2x16x16xf32>
    %cst_51 = arith.constant 0.000000e+00 : f32
    %114 = vector.broadcast %cst_51 : f32 to vector<2x16x16xf32>
    %115 = arith.select %113, %67, %114 : vector<2x16x16xi1>, vector<2x16x16xf32>
    %cst_52 = arith.constant dense<0xFF800000> : vector<2x16xf32>
    %116 = vector.multi_reduction <maximumf>, %115, %cst_52 [2] : vector<2x16x16xf32> to vector<2x16xf32>
    %117 = vector.shape_cast %116 : vector<2x16xf32> to vector<2x16x1xf32>
    %118 = vector.broadcast %117 : vector<2x16x1xf32> to vector<2x16x16xf32>
    %119 = arith.subf %115, %118 : vector<2x16x16xf32>
    %120 = math.exp %119 : vector<2x16x16xf32>
    %cst_53 = arith.constant dense<0.000000e+00> : vector<2x16xf32>
    %121 = vector.multi_reduction <add>, %120, %cst_53 [2] : vector<2x16x16xf32> to vector<2x16xf32>
    %122 = vector.shape_cast %121 : vector<2x16xf32> to vector<2x16x1xf32>
    %123 = tpu.reciprocal %122 {approx = true} : vector<2x16x1xf32> -> vector<2x16x1xf32>
    %124 = vector.broadcast %123 : vector<2x16x1xf32> to vector<2x16x16xf32>
    %125 = arith.mulf %120, %124 : vector<2x16x16xf32>
    %c0_54 = arith.constant 0 : index
    %c0_55 = arith.constant 0 : index
    %c0_56 = arith.constant 0 : index
    %126 = vector.load %arg10[%c0_54, %c0_55, %c0_56] : memref<2x16x16xf32, #tpu.memory_space<vmem>>, vector<2x16x16xf32>
    tpu.vector_store %arg10[%c0_54, %c0_55, %c0_56], %125 {strides = array<i32>} : memref<2x16x16xf32, #tpu.memory_space<vmem>>, vector<2x16x16xf32>,
    return
  }
  func.func @transform_0(%arg0: i32) -> (i32, i32) {
    %c0_i32 = arith.constant 0 : i32
    %c0_i32_0 = arith.constant 0 : i32
    %c0_i32_1 = arith.constant 0 : i32
    return %c0_i32, %c0_i32_0 : i32, i32
  }
  func.func @transform_1(%arg0: i32) -> (i32, i32) {
    %c0_i32 = arith.constant 0 : i32
    %c0_i32_0 = arith.constant 0 : i32
    %c0_i32_1 = arith.constant 0 : i32
    return %c0_i32, %c0_i32_0 : i32, i32
  }
  func.func @transform_2(%arg0: i32) -> (i32, i32) {
    %c0_i32 = arith.constant 0 : i32
    %c0_i32_0 = arith.constant 0 : i32
    %c0_i32_1 = arith.constant 0 : i32
    return %c0_i32, %c0_i32_0 : i32, i32
  }
  func.func @transform_3(%arg0: i32) -> (i32, i32) {
    %c0_i32 = arith.constant 0 : i32
    %c0_i32_0 = arith.constant 0 : i32
    %c0_i32_1 = arith.constant 0 : i32
    return %c0_i32, %c0_i32_0 : i32, i32
  }
  func.func @transform_4(%arg0: i32) -> (i32, i32) {
    %c0_i32 = arith.constant 0 : i32
    %c0_i32_0 = arith.constant 0 : i32
    %c0_i32_1 = arith.constant 0 : i32
    return %c0_i32, %c0_i32_0 : i32, i32
  }
  func.func @transform_5(%arg0: i32) -> (i32, i32) {
    %c0_i32 = arith.constant 0 : i32
    %c0_i32_0 = arith.constant 0 : i32
    %c0_i32_1 = arith.constant 0 : i32
    return %c0_i32, %c0_i32_0 : i32, i32
  }
  func.func @transform_6(%arg0: i32) -> (i32, i32) {
    %c0_i32 = arith.constant 0 : i32
    %c0_i32_0 = arith.constant 0 : i32
    %c0_i32_1 = arith.constant 0 : i32
    return %c0_i32, %c0_i32_0 : i32, i32
  }
  func.func @transform_7(%arg0: i32) -> (i32, i32) {
    %c0_i32 = arith.constant 0 : i32
    %c0_i32_0 = arith.constant 0 : i32
    %c0_i32_1 = arith.constant 0 : i32
    return %c0_i32, %c0_i32_0 : i32, i32
  }
  func.func @transform_8(%arg0: i32) -> (i32, i32) {
    %c0_i32 = arith.constant 0 : i32
    %c0_i32_0 = arith.constant 0 : i32
    %c0_i32_1 = arith.constant 0 : i32
    return %c0_i32, %c0_i32_0 : i32, i32
  }
  func.func @transform_9(%arg0: i32) -> (i32, i32, i32) {
    %c0_i32 = arith.constant 0 : i32
    %c0_i32_0 = arith.constant 0 : i32
    %c0_i32_1 = arith.constant 0 : i32
    %c0_i32_2 = arith.constant 0 : i32
    return %c0_i32, %c0_i32_0, %c0_i32_1 : i32, i32, i32
  }
}

</mosaic_0001>

<bundles_post_ra>
// kernel: tpu_custom_call.1
= control target key start
LH: loop header
LB: loop body
LE: loop exit
PB: predicated region body
PF: predicated region fallthrough
CT: control target
= control target key end

     0   :  { %vm52_vm0 = vcmask 1043456   ;;  %vm1552_vm1 = vmmov 1   ;;  %vm39_vm3 = vcmask 97280   ;;  %s1881_s0 = inlined_call_operand.vmem [shape: f32[32,12], index: 0, kind: input, shape index: {}]   ;;  %s1882_s1 = inlined_call_operand.vmem [shape: f32[12,14], index: 1, kind: input, shape index: {}]   ;;  %s1883_s2 = inlined_call_operand.vmem [shape: f32[7,8], index: 2, kind: input, shape index: {}]   ;;  %s1884_s3 = inlined_call_operand.vmem [shape: f32[32,24], index: 3, kind: input, shape index: {}]   ;;  %s1885_s4 = inlined_call_operand.vmem [shape: f32[8,128], index: 4, kind: input, shape index: {}]   ;;  %s1886_s5 = inlined_call_operand.vmem [shape: f32[24,128], index: 5, kind: input, shape index: {}]   ;;  %s1887_s6 = inlined_call_operand.vmem [shape: f32[32,128], index: 6, kind: input, shape index: {}]   ;;  %s1888_s7 = inlined_call_operand.vmem [shape: f32[128,8], index: 7, kind: input, shape index: {}]   ;;  %s1889_s8 = inlined_call_operand.vmem [shape: f32[8,8], index: 8, kind: input, shape index: {}]   ;;  %s1890_s9 = inlined_call_operand.hbm [shape: f32[2,16,16], index: 9, kind: output, shape index: {}]  }
   0x1   :  { %v37_v0 = vld [vmem:[%s1882_s1] sm:$0xff]  ;;  %v38_v1 = vld [vmem:[%s1882_s1 + $0x8] sm:$0xf]  ;;  %vm1426_vm2 = vmpackc.low %vm52_vm0, %vm1552_vm1 }
   0x2   :  { %v33_v2 = vld [vmem:[%s1881_s0] sm:$0xff]  ;;  %v1425_v3 = vpack.c.bf16 %v38_v1, %v37_v0 }
   0x3   :  { %1331 = vmatprep.mubr.msk.f32.mxu0 %vm39_vm3, %v33_v2 }
   0x4   :  { %14 = vsyncpa [#allocation3], 0  ;;  %1427 = vmatprep.subr.msk.bf16.mxu0 %vm1426_vm2, %v1425_v3  ;;  %v34_v4 = vld [vmem:[%s1881_s0 + $0x8] sm:$0xff]  ;;  %v35_v5 = vld [vmem:[%s1881_s0 + $0x10] sm:$0xff]  ;;  %s1553_s20 = smov 121   ;;  %vm193_vm4 = vcmask 56320  }
   0x5   :  { %1430 = vmatpush3.bf16.msk.msra.mxu0 %vm1426_vm2, %v1425_v3  ;;  %v36_v6 = vld [vmem:[%s1881_s0 + $0x18] sm:$0xff]  ;;  %v248_v27 = vld [vmem:[%s1883_s2] sm:$0x7f]  ;;  %vm261_vm5 = vcmask 1046528   ;;  %v356_v29 = vld [vmem:[%s1886_s5 + $0x8] sm:$0xff]  ;;  %vm358_vm14 = vcmask 195584  }
   0x6   :  { %1337 = vmatprep.subr.msk.mxu1 %vm261_vm5, %v248_v27  ;;  %v355_v28 = vld [vmem:[%s1886_s5] sm:$0xff]  ;;  %vm456_vm15 = vcmask 64512   ;;  %vm1016_vm1 = vcmask 130048  }
   0x7   :  { %1338 = vmatpush3.msk.msra.mxu1 %vm261_vm5, %v248_v27  ;;  %v1644_v30 = vpack.c.bf16 %v356_v29, %v355_v28  ;;  %vm1756_vm0 = vmpackc.low %vm456_vm15, %vm456_vm15 }
   0x8   :  { %1332 = vmatmul.mubr.msk.f32.vlgmr.msra.gmra.mrb[0].mxu0 %vm39_vm3, %v34_v4 }
   0x9   :  { %1334 = vmatprep.mubr.msk.f32.mxu0 %vm39_vm3, %v35_v5  ;;  %1432 = vmatprep.subr.bf16.mxu1 %v1644_v30 }
   0xc   :  { %1335 = vmatmul.mubr.msk.f32.gmra.mrb[2].mxu0 %vm39_vm3, %v36_v6 }
  0xdb   :  { %v1333_v7 = vpop.f32.mrb[0].mxu0 }
  0xdc   :  { %v122_v8 = vpop.f32.mrb[1].mxu0  ;;  %v142_v12 = vmul.f32 %v1333_v7, %v1333_v7 }
  0xdd   :  { %v141_v9 = vmul.f32 %v122_v8, %v122_v8 }
  0xdf   :  { %149 = vrot.lane.b32.xlu0 %v141_v9, %s1553_s20  ;;  %v1336_v10 = vpop.f32.mrb[2].mxu0 }
  0xe0   :  { %v132_v11 = vpop.f32.mrb[3].mxu0  ;;  %v144_v14 = vmul.f32 %v1336_v10, %v1336_v10 }
  0xe1   :  { %v143_v13 = vmul.f32 %v132_v11, %v132_v11 }
  0xe3   :  { %151 = vrot.lane.b32.xlu0 %v142_v12, %s1553_s20  ;;  %153 = vrot.lane.b32.xlu1 %v143_v13, %s1553_s20 }
  0xe7   :  { %155 = vrot.lane.b32.xlu1 %v144_v14, %s1553_s20 }
 0x151   :  { %v150_v15 = vpop.permute.xlu0 %149 }
 0x152   :  { %v161_v16 = vadd.f32 %v150_v15, %v141_v9 }
 0x154   :  { %v194_v17 = vsel %vm193_vm4, %v161_v16, 0.0  ;;  %1488 = vrsqrt.f32 %v161_v16  ;;  %vm167_vm6 = vcmp.eq.f32.partialorder %v161_v16, inf  ;;  %v170_v47 = vand.u32 2147483648, %v161_v16 }
 0x155   :  { %195 = vadd.xlane.f32.xlu0 %v194_v17  ;;  %v152_v18 = vpop.permute.xlu0 %151  ;;  %v154_v19 = vpop.permute.xlu1 %153  ;;  %vm169_vm7 = vcmp.eq.f32.partialorder %v161_v16, 0.0 }
 0x156   :  { %v1626_v20 = vadd.f32 %v152_v18, %v142_v12  ;;  %v163_v21 = vadd.f32 %v154_v19, %v143_v13 }
 0x158   :  { %v197_v22 = vsel %vm193_vm4, %v1626_v20, 0.0  ;;  %v200_v23 = vsel %vm193_vm4, %v163_v21, 0.0  ;;  %1490 = vrsqrt.f32 %v163_v21  ;;  %vm181_vm8 = vcmp.eq.f32.partialorder %v163_v21, inf }
 0x159   :  { %198 = vadd.xlane.f32.xlu1 %v197_v22  ;;  %201 = vadd.xlane.f32.xlu0 %v200_v23  ;;  %v156_v24 = vpop.permute.xlu1 %155  ;;  %1492 = vrsqrt.f32 %v1626_v20  ;;  %vm174_vm9 = vcmp.eq.f32.partialorder %v1626_v20, inf  ;;  %v184_v54 = vand.u32 2147483648, %v163_v21  ;;  %v177_v55 = vand.u32 2147483648, %v1626_v20 }
 0x15a   :  { %v1631_v25 = vadd.f32 %v156_v24, %v144_v14  ;;  %vm183_vm10 = vcmp.eq.f32.partialorder %v163_v21, 0.0  ;;  %vm176_vm11 = vcmp.eq.f32.partialorder %v1626_v20, 0.0 }
 0x15c   :  { %v203_v26 = vsel %vm193_vm4, %v1631_v25, 0.0  ;;  %1494 = vrsqrt.f32 %v1631_v25  ;;  %vm188_vm12 = vcmp.eq.f32.partialorder %v1631_v25, inf  ;;  %v191_v63 = vand.u32 2147483648, %v1631_v25 }
 0x15d   :  { %204 = vadd.xlane.f32.xlu0 %v203_v26  ;;  %vm190_vm13 = vcmp.eq.f32.partialorder %v1631_v25, 0.0 }
 0x15e   :  { %v1489_v33 = vpop.eup %1488 }
 0x15f   :  { %v166_v39 = vmul.f32 %v1489_v33, %v161_v16 }
 0x161   :  { %v168_v46 = vsel %vm167_vm6, %v161_v16, %v166_v39  ;;  %v562_v39 = vld [vmem:[%s1888_s7] sm:$0xff] }
 0x162   :  { %v1491_v38 = vpop.eup %1490  ;;  %v171_v50 = vsel %vm169_vm7, %v170_v47, %v168_v46  ;;  %v567_v46 = vld [vmem:[%s1888_s7 + $0x28] sm:$0xff] }
 0x163   :  { %v1493_v40 = vpop.eup %1492  ;;  %v180_v43 = vmul.f32 %v1491_v38, %v163_v21  ;;  %v354_v38 = vld [vmem:[%s1884_s3 + $0x18] sm:$0xff] }
 0x164   :  { %v173_v45 = vmul.f32 %v1493_v40, %v1626_v20  ;;  %v563_v40 = vld [vmem:[%s1888_s7 + $0x8] sm:$0xff] }
 0x165   :  { %v182_v51 = vsel %vm181_vm8, %v163_v21, %v180_v43  ;;  %v565_v43 = vld [vmem:[%s1888_s7 + $0x18] sm:$0xff] }
 0x166   :  { %v1495_v44 = vpop.eup %1494  ;;  %v175_v52 = vsel %vm174_vm9, %v1626_v20, %v173_v45  ;;  %v185_v57 = vsel %vm183_vm10, %v184_v54, %v182_v51  ;;  %v566_v45 = vld [vmem:[%s1888_s7 + $0x20] sm:$0xff]  ;;  %v572_v54 = vld [vmem:[%s1888_s7 + $0x50] sm:$0xff] }
 0x167   :  { %v187_v49 = vmul.f32 %v1495_v44, %v1631_v25  ;;  %v178_v59 = vsel %vm176_vm11, %v177_v55, %v175_v52  ;;  %v1443_v47 = vpack.c.bf16 %v567_v46, %v566_v45  ;;  %v570_v51 = vld [vmem:[%s1888_s7 + $0x40] sm:$0xff]  ;;  %v571_v52 = vld [vmem:[%s1888_s7 + $0x48] sm:$0xff]  ;;  %v573_v55 = vld [vmem:[%s1888_s7 + $0x58] sm:$0xff] }
 0x169   :  { %v189_v60 = vsel %vm188_vm12, %v1631_v25, %v187_v49  ;;  %v569_v49 = vld [vmem:[%s1888_s7 + $0x38] sm:$0xff] }
 0x16a   :  { %v192_v2 = vsel %vm190_vm13, %v191_v63, %v189_v60 }
 0x1e2   :  { %v196_v31 = vpop.xlane.xlu0 %195 }
 0x1e3   :  { %v206_v32 = vmax.f32 %v196_v31, 1e-24 }
 0x1e5   :  { %1496 = vrsqrt.f32 %v206_v32  ;;  %v357_v32 = vld [vmem:[%s1886_s5 + $0x10] sm:$0xff] }
 0x1e6   :  { %v202_v34 = vpop.xlane.xlu0 %201  ;;  %v199_v35 = vpop.xlane.xlu1 %198 }
 0x1e7   :  { %v208_v36 = vmax.f32 %v202_v34, 1e-24  ;;  %v207_v37 = vmax.f32 %v199_v35, 1e-24  ;;  %v351_v35 = vld [vmem:[%s1884_s3] sm:$0xff] }
 0x1e9   :  { %1498 = vrsqrt.f32 %v208_v36  ;;  %v350_v36 = vld [vmem:[%s1885_s4] sm:$0xff] }
 0x1ea   :  { %1500 = vrsqrt.f32 %v207_v37  ;;  %v205_v41 = vpop.xlane.xlu0 %204  ;;  %v353_v37 = vld [vmem:[%s1884_s3 + $0x10] sm:$0xff] }
 0x1eb   :  { %v209_v42 = vmax.f32 %v205_v41, 1e-24  ;;  %v564_v41 = vld [vmem:[%s1888_s7 + $0x10] sm:$0xff] }
 0x1ec   :  { %v1439_v44 = vpack.c.bf16 %v565_v43, %v564_v41 }
 0x1ed   :  { %1502 = vrsqrt.f32 %v209_v42  ;;  %v1435_v42 = vpack.c.bf16 %v563_v40, %v562_v39 }
 0x1ef   :  { %v1497_v48 = vpop.eup %1496  ;;  %1436 = vmatprep.subr.bf16.mxu0 %v1435_v42 }
 0x1f0   :  { %v214_v53 = vmul.f32 %v1497_v48, %v171_v50  ;;  %1438 = vmatpush3.bf16.msra.mxu0 %v1435_v42  ;;  %v568_v48 = vld [vmem:[%s1888_s7 + $0x30] sm:$0xff] }
 0x1f1   :  { %1440 = vmatprep.subr.bf16.mxu0 %v1439_v44  ;;  %v1447_v50 = vpack.c.bf16 %v569_v49, %v568_v48 }
 0x1f2   :  { %v218_v0 = vmul.f32 %v214_v53, %v214_v53 }
 0x1f3   :  { %v1499_v56 = vpop.eup %1498 }
 0x1f4   :  { %v1501_v58 = vpop.eup %1500  ;;  %v216_v61 = vmul.f32 %v1499_v56, %v185_v57  ;;  %v222_v6 = vsel %vm193_vm4, %v218_v0, 0.0  ;;  %1442 = vmatpush3.bf16.msra.mxu0 %v1439_v44  ;;  %v1455_v56 = vpack.c.bf16 %v573_v55, %v572_v54  ;;  %v574_v57 = vld [vmem:[%s1888_s7 + $0x60] sm:$0xff]  ;;  %v576_v0 = vld [vmem:[%s1888_s7 + $0x70] sm:$0xff] }
 0x1f5   :  { %v215_v62 = vmul.f32 %v1501_v58, %v178_v59  ;;  %1444 = vmatprep.subr.bf16.mxu0 %v1443_v47  ;;  %v575_v58 = vld [vmem:[%s1888_s7 + $0x68] sm:$0xff] }
 0x1f6   :  { %v220_v5 = vmul.f32 %v216_v61, %v216_v61  ;;  %v1459_v59 = vpack.c.bf16 %v575_v58, %v574_v57 }
 0x1f7   :  { %v1503_v1 = vpop.eup %1502  ;;  %v219_v3 = vmul.f32 %v215_v62, %v215_v62 }
 0x1f8   :  { %v217_v4 = vmul.f32 %v1503_v1, %v192_v2  ;;  %v231_v11 = vsel %vm193_vm4, %v220_v5, 0.0  ;;  %1446 = vmatpush3.bf16.msra.mxu0 %v1443_v47  ;;  %v577_v1 = vld [vmem:[%s1888_s7 + $0x78] sm:$0xff]  ;;  %v555_v5 = vld [vmem:[%s1887_s6 + $0x8] sm:$0xff] }
 0x1f9   :  { %v223_v7 = vsel %vm193_vm4, %v219_v3, 0.0  ;;  %1448 = vmatprep.subr.bf16.mxu0 %v1447_v50  ;;  %v1463_v2 = vpack.c.bf16 %v577_v1, %v576_v0  ;;  %v554_v3 = vld [vmem:[%s1887_s6] sm:$0xff] }
 0x1fa   :  { %v221_v8 = vmul.f32 %v217_v4, %v217_v4  ;;  %v224_v9 = vadd.f32 %v223_v7, %v222_v6 }
 0x1fc   :  { %v225_v10 = vrot.slane %v224_v9, 4  ;;  %v232_v12 = vsel %vm193_vm4, %v221_v8, 0.0  ;;  %1450 = vmatpush3.bf16.msra.mxu0 %v1447_v50 }
 0x1fd   :  { %v233_v13 = vadd.f32 %v232_v12, %v231_v11  ;;  %v557_v11 = vld [vmem:[%s1887_s6 + $0x18] sm:$0xff] }
 0x1fe   :  { %v226_v14 = vadd.f32 %v225_v10, %v224_v9  ;;  %v556_v9 = vld [vmem:[%s1887_s6 + $0x10] sm:$0xff]  ;;  %s1554_s6 = smov [#allocation2]  }
 0x1ff   :  { %v234_v15 = vrot.slane %v233_v13, 4 }
 0x200   :  { %v227_v16 = vrot.slane %v226_v14, 2 }
 0x201   :  { %v235_v17 = vadd.f32 %v234_v15, %v233_v13  ;;  %v740_v15 = vld [vmem:[%s1889_s8] sm:$0xff]  ;;  %s1230_s8 = sshll.u32 %s1554_s6, 4  ;;  %s1231_s8 = int_to_ptr.vmem [resolvable:$true] %s1230_s8 }
 0x202   :  { %v228_v18 = vadd.f32 %v227_v16, %v226_v14  ;;  %s1528_s25 = scalar_lea.vmem %s1231_s8, 512  ;;  %p1533_p1 = scmp.lt.s32.totalorder %s1231_s8, %s1231_s8 }
 0x203   :  { %v236_v19 = vrot.slane %v235_v17, 2  ;;  %p1529_p0 = scmp.ne.s32.totalorder %s1231_s8, %s1528_s25  ;;  %p1534_p2 = scmp.lt.s32.totalorder %s1528_s25, %s1528_s25 }
 0x204   :  { %v229_v20 = vrot.slane %v228_v18, 1 }
 0x205   :  { %v237_v21 = vadd.f32 %v236_v19, %v235_v17  ;;  %p1535_p3 = por %p1534_p2, %p1533_p1 }
 0x206   :  { %v230_v22 = vadd.f32 %v229_v20, %v228_v18 }
 0x207   :  { %v238_v23 = vrot.slane %v237_v21, 1  ;;  %p1536_p4 = pnand %p1535_p3, %p1529_p0 }
 0x208   :  { %v240_v24 = vmax.f32 %v230_v22, 1e-24 }
 0x209   :  { %v239_v25 = vadd.f32 %v238_v23, %v237_v21 }
 0x20a   :  { %1504 = vrsqrt.f32 %v240_v24 }
 0x20b   :  { %v241_v26 = vmax.f32 %v239_v25, 1e-24 }
 0x20d   :  { %1506 = vrsqrt.f32 %v241_v26 }
 0x214   :  { %v1505_v27 = vpop.eup %1504 }
 0x215   :  { %v244_v28 = vmul.f32 %v1505_v27, %v214_v53  ;;  %v245_v29 = vmul.f32 %v1505_v27, %v215_v62  ;;  %v1451_v53 = vpack.c.bf16 %v571_v52, %v570_v51 }
 0x217   :  { %v1507_v31 = vpop.eup %1506  ;;  %1339 = vmatprep.mubr.msk.f32.mxu1 %vm193_vm4, %v244_v28  ;;  %1452 = vmatprep.subr.bf16.mxu0 %v1451_v53 }
 0x218   :  { %1340 = vmatmul.mubr.msk.f32.vlgmr.msra.gmra.mrb[0].mxu1 %vm193_vm4, %v245_v29  ;;  %v246_v33 = vmul.f32 %v1507_v31, %v216_v61  ;;  %v247_v34 = vmul.f32 %v1507_v31, %v217_v4  ;;  %1454 = vmatpush3.bf16.msra.mxu0 %v1451_v53 }
 0x219   :  { %1434 = vmatpush3.bf16.msra.mxu1 %v1644_v30  ;;  %v352_v30 = vld [vmem:[%s1884_s3 + $0x8] sm:$0xff]  ;;  %1456 = vmatprep.subr.bf16.mxu0 %v1455_v56 }
 0x21a   :  { %1342 = vmatprep.mubr.msk.f32.mxu1 %vm193_vm4, %v246_v33  ;;  %1349 = vmatprep.subr.mxu1 %v357_v32 }
 0x21c   :  { %1343 = vmatmul.mubr.msk.f32.gmra.mrb[2].mxu1 %vm193_vm4, %v247_v34  ;;  %1458 = vmatpush3.bf16.msra.mxu0 %v1455_v56 }
 0x21d   :  { %1350 = vmatpush3.msra.mxu1 %v357_v32  ;;  %1351 = vmatprep.mubr.msk.f32.mxu1 %vm358_vm14, %v351_v35 }
 0x21e   :  { %1357 = vmatprep.subr.mxu1 %v350_v36  ;;  %1460 = vmatprep.subr.bf16.mxu0 %v1459_v59 }
 0x220   :  { %1352 = vmatmul.mubr.msk.f32.vlgmr.msra.gmra.mrb[4].mxu1 %vm358_vm14, %v352_v30  ;;  %1462 = vmatpush3.bf16.msra.mxu0 %v1459_v59 }
 0x221   :  { %1358 = vmatpush3.msra.mxu1 %v350_v36  ;;  %1354 = vmatprep.mubr.msk.f32.mxu1 %vm358_vm14, %v353_v37 }
 0x222   :  { %1464 = vmatprep.subr.bf16.mxu0 %v1463_v2  ;;  %1403 = vmatprep.subr.mxu1 %v740_v15 }
 0x224   :  { %1355 = vmatmul.mubr.msk.f32.gmra.mrb[6].mxu1 %vm358_vm14, %v354_v38  ;;  %1466 = vmatpush3.bf16.msra.mxu0 %v1463_v2 }
 0x2eb   :  { %v1341_v60 = vpop.f32.mrb[0].mxu1 }
 0x2ec   :  { %v331_v61 = vpop.f32.mrb[1].mxu1 }
 0x2ed   :  { %1359 = vmatprep.mubr.msk.f32.mxu1 %vm456_vm15, %v331_v61 }
 0x2ee   :  { %1360 = vmatmul.mubr.msk.f32.vlgmr.msra.gmra.mrb[4].mxu1 %vm456_vm15, %v1341_v60 }
 0x2ef   :  { %v1344_v62 = vpop.f32.mrb[2].mxu1  ;;  %1404 = vmatpush3.msra.mxu1 %v740_v15 }
 0x2f0   :  { %v341_v63 = vpop.f32.mrb[3].mxu1 }
 0x2f1   :  { %1362 = vmatprep.mubr.msk.f32.mxu1 %vm456_vm15, %v341_v63 }
 0x2f2   :  { %1363 = vmatmul.mubr.msk.f32.gmra.mrb[6].mxu1 %vm456_vm15, %v1344_v62 }
 0x3c1   :  { %v1361_v4 = vpop.f32.mrb[4].mxu1 }
 0x3c2   :  { %v535_v6 = vpop.f32.mrb[5].mxu1  ;;  %v559_v8 = vmul.f32 %v1361_v4, %v555_v5 }
 0x3c3   :  { %v558_v7 = vmul.f32 %v554_v3, %v535_v6 }
 0x3c5   :  { %v1364_v10 = vpop.f32.mrb[6].mxu1  ;;  %1397 = vmatprep.mubr.f32.mxu0 %v558_v7 }
 0x3c6   :  { %v545_v12 = vpop.f32.mrb[7].mxu1  ;;  %1398 = vmatmul.mubr.f32.vlgmr.msra.gmra.mrb[4].mxu0 %v559_v8  ;;  %v561_v14 = vmul.f32 %v1364_v10, %v557_v11 }
 0x3c7   :  { %v560_v13 = vmul.f32 %v556_v9, %v545_v12 }
 0x3c9   :  { %1400 = vmatprep.mubr.f32.mxu0 %v560_v13 }
 0x3ca   :  { %1401 = vmatmul.mubr.f32.gmra.mrb[6].mxu0 %v561_v14 }
 0x499   :  { %v1399_v16 = vpop.f32.mrb[4].mxu0 }
 0x49a   :  { %v664_v17 = vmax.f32 %v1399_v16, 0.0  ;;  %v644_v18 = vpop.f32.mrb[5].mxu0 }
 0x49b   :  { %v663_v19 = vmax.f32 %v644_v18, 0.0 }
 0x49c   :  { %v670_v20 = vsel %vm456_vm15, %v664_v17, 0.0 }
 0x49d   :  { %v1760_v22 = vpack.c.bf16 %v664_v17, %v663_v19  ;;  %671 = vadd.xlane.f32.xlu0 %v670_v20  ;;  %v1402_v23 = vpop.f32.mrb[6].mxu0  ;;  %v667_v24 = vsel %vm456_vm15, %v663_v19, 0.0 }
 0x49e   :  { %v1763_v25 = vmax.f32 %v1402_v23, 0.0  ;;  %668 = vadd.xlane.f32.xlu1 %v667_v24  ;;  %v654_v26 = vpop.f32.mrb[7].mxu0 }
 0x49f   :  { %v1765_v27 = vmax.f32 %v654_v26, 0.0  ;;  %1469 = vmatprep.subr.msk.bf16.mxu1 %vm1756_vm0, %v1760_v22 }
 0x4a0   :  { %v676_v28 = vsel %vm456_vm15, %v1763_v25, 0.0 }
 0x4a1   :  { %677 = vadd.xlane.f32.xlu0 %v676_v28  ;;  %v673_v29 = vsel %vm456_vm15, %v1765_v27, 0.0  ;;  %v1473_v28 = vpack.c.bf16 %v1763_v25, %v1765_v27 }
 0x4a2   :  { %674 = vadd.xlane.f32.xlu1 %v673_v29 }
 0x52a   :  { %v672_v31 = vpop.xlane.xlu0 %671 }
 0x52b   :  { %v669_v32 = vpop.xlane.xlu1 %668 }
 0x52c   :  { %v679_v33 = vadd.f32 %v672_v31, %v669_v32 }
 0x52e   :  { %v680_v34 = vrot.slane %v679_v33, 4  ;;  %v678_v35 = vpop.xlane.xlu0 %677 }
 0x52f   :  { %v675_v36 = vpop.xlane.xlu1 %674 }
 0x530   :  { %v681_v30 = vadd.f32 %v680_v34, %v679_v33  ;;  %v686_v37 = vadd.f32 %v678_v35, %v675_v36 }
 0x532   :  { %v682_v38 = vrot.slane %v681_v30, 2  ;;  %v687_v39 = vrot.slane %v686_v37, 4 }
 0x534   :  { %v683_v40 = vadd.f32 %v682_v38, %v681_v30  ;;  %v688_v41 = vadd.f32 %v687_v39, %v686_v37 }
 0x536   :  { %v684_v42 = vrot.slane %v683_v40, 1  ;;  %v689_v43 = vrot.slane %v688_v41, 2 }
 0x538   :  { %v685_v44 = vadd.f32 %v684_v42, %v683_v40  ;;  %v690_v45 = vadd.f32 %v689_v43, %v688_v41 }
 0x53a   :  { %v691_v46 = vrot.slane %v690_v45, 1  ;;  %v694_v47 = vmul.f32 0.0078125, %v685_v44 }
 0x53c   :  { %v692_v48 = vadd.f32 %v691_v46, %v690_v45  ;;  %v697_v49 = vsub.f32 %v664_v17, %v694_v47  ;;  %v696_v50 = vsub.f32 %v663_v19, %v694_v47 }
 0x53e   :  { %v701_v51 = vmul.f32 %v697_v49, %v697_v49  ;;  %v700_v52 = vmul.f32 %v696_v50, %v696_v50  ;;  %v695_v53 = vmul.f32 0.0078125, %v692_v48 }
 0x540   :  { %v707_v54 = vsel %vm456_vm15, %v701_v51, 0.0  ;;  %v704_v55 = vsel %vm456_vm15, %v700_v52, 0.0  ;;  %v699_v56 = vsub.f32 %v1763_v25, %v695_v53  ;;  %v698_v57 = vsub.f32 %v1765_v27, %v695_v53 }
 0x541   :  { %708 = vadd.xlane.f32.xlu0 %v707_v54  ;;  %705 = vadd.xlane.f32.xlu1 %v704_v55 }
 0x542   :  { %v703_v58 = vmul.f32 %v699_v56, %v699_v56  ;;  %v702_v59 = vmul.f32 %v698_v57, %v698_v57 }
 0x544   :  { %v713_v60 = vsel %vm456_vm15, %v703_v58, 0.0  ;;  %v710_v61 = vsel %vm456_vm15, %v702_v59, 0.0 }
 0x545   :  { %714 = vadd.xlane.f32.xlu0 %v713_v60  ;;  %711 = vadd.xlane.f32.xlu1 %v710_v61 }
 0x5ce   :  { %v709_v62 = vpop.xlane.xlu0 %708  ;;  %v706_v63 = vpop.xlane.xlu1 %705 }
 0x5cf   :  { %v716_v0 = vadd.f32 %v709_v62, %v706_v63 }
 0x5d1   :  { %v717_v1 = vrot.slane %v716_v0, 4 }
 0x5d2   :  { %v715_v2 = vpop.xlane.xlu0 %714  ;;  %v712_v3 = vpop.xlane.xlu1 %711 }
 0x5d3   :  { %v718_v4 = vadd.f32 %v717_v1, %v716_v0  ;;  %v723_v5 = vadd.f32 %v715_v2, %v712_v3 }
 0x5d5   :  { %v719_v6 = vrot.slane %v718_v4, 2  ;;  %v724_v7 = vrot.slane %v723_v5, 4 }
 0x5d7   :  { %v720_v8 = vadd.f32 %v719_v6, %v718_v4  ;;  %v725_v9 = vadd.f32 %v724_v7, %v723_v5 }
 0x5d9   :  { %v721_v10 = vrot.slane %v720_v8, 1  ;;  %v726_v11 = vrot.slane %v725_v9, 2 }
 0x5db   :  { %v722_v12 = vadd.f32 %v721_v10, %v720_v8  ;;  %v727_v13 = vadd.f32 %v726_v11, %v725_v9 }
 0x5dd   :  { %v730_v14 = vmul.f32 0.0078125, %v722_v12  ;;  %v728_v15 = vrot.slane %v727_v13, 1 }
 0x5df   :  { %v732_v16 = vadd.f32 1e-08, %v730_v14  ;;  %v729_v17 = vadd.f32 %v728_v15, %v727_v13 }
 0x5e1   :  { %1508 = vrsqrt.f32 %v732_v16  ;;  %v731_v18 = vmul.f32 0.0078125, %v729_v17 }
 0x5e3   :  { %v733_v19 = vadd.f32 1e-08, %v731_v18 }
 0x5e5   :  { %1510 = vrsqrt.f32 %v733_v19 }
 0x5eb   :  { %v1509_v20 = vpop.eup %1508 }
 0x5ec   :  { %v736_v23 = vmul.f32 %v1509_v20, %v696_v50  ;;  %v737_v24 = vmul.f32 %v1509_v20, %v697_v49 }
 0x5ee   :  { %1405 = vmatprep.mubr.msk.f32.mxu1 %vm456_vm15, %v736_v23 }
 0x5ef   :  { %v1511_v26 = vpop.eup %1510  ;;  %1406 = vmatmul.mubr.msk.f32.vlgmr.msra.gmra.mrb[8].mxu1 %vm456_vm15, %v737_v24 }
 0x5f0   :  { %1472 = vmatpush3.bf16.xpose.msk.msra.mxu1 %vm1756_vm0, %v1760_v22  ;;  %v738_v29 = vmul.f32 %v1511_v26, %v698_v57  ;;  %v739_v31 = vmul.f32 %v1511_v26, %v699_v56 }
 0x5f1   :  { %1475 = vmatprep.subr.msk.bf16.mxu1 %vm1756_vm0, %v1473_v28 }
 0x5f2   :  { %1408 = vmatprep.mubr.msk.f32.mxu1 %vm456_vm15, %v738_v29 }
 0x5f3   :  { %1409 = vmatmul.mubr.msk.f32.gmra.mrb[10].mxu1 %vm456_vm15, %v739_v31 }
 0x6c2   :  { %v1407_v32 = vpop.f32.mrb[8].mxu1 }
 0x6c3   :  { %v819_v33 = vpop.f32.mrb[9].mxu1 }
 0x6c4   :  { %1415 = vmatprep.mubr.msk.f32.mxu1 %vm456_vm15, %v819_v33 }
 0x6c5   :  { %1416 = vmatmul.mubr.msk.f32.vlgmr.msra.gmra.mrb[12].mxu1 %vm456_vm15, %v1407_v32 }
 0x6c6   :  { %1478 = vmatpush3.bf16.xpose.msk.msra.mxu1 %vm1756_vm0, %v1473_v28  ;;  %v1410_v25 = vpop.f32.mrb[10].mxu1 }
 0x6c7   :  { %v829_v22 = vpop.f32.mrb[11].mxu1 }
 0x6c8   :  { %1422 = vmatprep.mubr.msk.f32.mxu1 %vm456_vm15, %v829_v22 }
 0x6cd   :  { %1423 = vmatmul.mubr.msk.f32.vlgmr.msra.gmra.mrb[14].mxu1 %vm456_vm15, %v1410_v25 }
 0x798   :  { %v1417_v27 = vpop.f32.mrb[12].mxu1 }
 0x799   :  { %v1797_v34 = vmax.f32 %v1417_v27, 0.0  ;;  %v916_v35 = vpop.f32.mrb[13].mxu1 }
 0x79a   :  { %v1799_v36 = vmax.f32 %v916_v35, 0.0 }
 0x79b   :  { %v1020_v30 = vsel %vm1016_vm1, %v1797_v34, -inf }
 0x79c   :  { %1021 = vmax.xlane.f32.xlu0 %v1020_v30  ;;  %v1017_v21 = vsel %vm1016_vm1, %v1799_v36, -inf }
 0x79d   :  { %1018 = vmax.xlane.f32.xlu1 %v1017_v21 }
 0x7a0   :  { %v1424_v37 = vpop.f32.mrb[14].mxu1 }
 0x7a1   :  { %v1805_v38 = vmax.f32 %v1424_v37, 0.0  ;;  %v1003_v39 = vpop.f32.mrb[15].mxu1 }
 0x7a2   :  { %v1807_v40 = vmax.f32 %v1003_v39, 0.0 }
 0x7a3   :  { %v1026_v41 = vsel %vm1016_vm1, %v1805_v38, -inf }
 0x7a4   :  { %1027 = vmax.xlane.f32.xlu0 %v1026_v41  ;;  %v1023_v42 = vsel %vm1016_vm1, %v1807_v40, -inf }
 0x7a5   :  { %1024 = vmax.xlane.f32.xlu1 %v1023_v42 }
 0x829   :  { %v1022_v43 = vpop.xlane.xlu0 %1021 }
 0x82a   :  { %vm1030_vm2 = vcmp.ge.f32.partialorder %v1797_v34, %v1022_v43  ;;  %v1019_v44 = vpop.xlane.xlu1 %1018 }
 0x82b   :  { %v1034_v45 = vsel %vm1030_vm2, -1e+30, %v1797_v34  ;;  %vm1029_vm3 = vcmp.ge.f32.partialorder %v1799_v36, %v1019_v44 }
 0x82c   :  { %v1033_v46 = vsel %vm1029_vm3, -1e+30, %v1799_v36  ;;  %v1040_v47 = vsel %vm1016_vm1, %v1034_v45, -inf }
 0x82d   :  { %1041 = vmax.xlane.f32.xlu0 %v1040_v47  ;;  %v1037_v48 = vsel %vm1016_vm1, %v1033_v46, -inf }
 0x82e   :  { %1038 = vmax.xlane.f32.xlu1 %v1037_v48 }
 0x831   :  { %v1028_v49 = vpop.xlane.xlu0 %1027 }
 0x832   :  { %vm1032_vm4 = vcmp.ge.f32.partialorder %v1805_v38, %v1028_v49  ;;  %v1025_v50 = vpop.xlane.xlu1 %1024 }
 0x833   :  { %v1036_v51 = vsel %vm1032_vm4, -1e+30, %v1805_v38  ;;  %vm1031_vm5 = vcmp.ge.f32.partialorder %v1807_v40, %v1025_v50 }
 0x834   :  { %v1035_v52 = vsel %vm1031_vm5, -1e+30, %v1807_v40  ;;  %v1046_v53 = vsel %vm1016_vm1, %v1036_v51, -inf }
 0x835   :  { %1047 = vmax.xlane.f32.xlu0 %v1046_v53  ;;  %v1043_v54 = vsel %vm1016_vm1, %v1035_v52, -inf }
 0x836   :  { %1044 = vmax.xlane.f32.xlu1 %v1043_v54 }
 0x8ba   :  { %v1042_v55 = vpop.xlane.xlu0 %1041 }
 0x8bb   :  { %vm1050_vm6 = vcmp.ge.f32.partialorder %v1034_v45, %v1042_v55  ;;  %v1039_v56 = vpop.xlane.xlu1 %1038 }
 0x8bc   :  { %v1054_v57 = vsel %vm1050_vm6, -1e+30, %v1034_v45  ;;  %vm1049_vm7 = vcmp.ge.f32.partialorder %v1033_v46, %v1039_v56 }
 0x8bd   :  { %v1053_v58 = vsel %vm1049_vm7, -1e+30, %v1033_v46  ;;  %v1060_v59 = vsel %vm1016_vm1, %v1054_v57, -inf }
 0x8be   :  { %1061 = vmax.xlane.f32.xlu0 %v1060_v59  ;;  %v1057_v60 = vsel %vm1016_vm1, %v1053_v58, -inf }
 0x8bf   :  { %1058 = vmax.xlane.f32.xlu1 %v1057_v60 }
 0x8c2   :  { %v1048_v61 = vpop.xlane.xlu0 %1047 }
 0x8c3   :  { %vm1052_vm8 = vcmp.ge.f32.partialorder %v1036_v51, %v1048_v61  ;;  %v1045_v62 = vpop.xlane.xlu1 %1044 }
 0x8c4   :  { %v1056_v63 = vsel %vm1052_vm8, -1e+30, %v1036_v51  ;;  %vm1051_vm9 = vcmp.ge.f32.partialorder %v1035_v52, %v1045_v62 }
 0x8c5   :  { %v1055_v0 = vsel %vm1051_vm9, -1e+30, %v1035_v52  ;;  %v1066_v1 = vsel %vm1016_vm1, %v1056_v63, -inf }
 0x8c6   :  { %1067 = vmax.xlane.f32.xlu0 %v1066_v1  ;;  %v1063_v2 = vsel %vm1016_vm1, %v1055_v0, -inf }
 0x8c7   :  { %1064 = vmax.xlane.f32.xlu1 %v1063_v2 }
 0x94b   :  { %v1062_v3 = vpop.xlane.xlu0 %1061 }
 0x94c   :  { %vm1070_vm10 = vcmp.ge.f32.partialorder %v1054_v57, %v1062_v3  ;;  %v1059_v4 = vpop.xlane.xlu1 %1058 }
 0x94d   :  { %v1074_v5 = vsel %vm1070_vm10, -1e+30, %v1054_v57  ;;  %vm1069_vm11 = vcmp.ge.f32.partialorder %v1053_v58, %v1059_v4 }
 0x94e   :  { %v1073_v6 = vsel %vm1069_vm11, -1e+30, %v1053_v58  ;;  %v1080_v7 = vsel %vm1016_vm1, %v1074_v5, -inf }
 0x94f   :  { %1081 = vmax.xlane.f32.xlu0 %v1080_v7  ;;  %v1077_v8 = vsel %vm1016_vm1, %v1073_v6, -inf }
 0x950   :  { %1078 = vmax.xlane.f32.xlu1 %v1077_v8 }
 0x953   :  { %v1068_v9 = vpop.xlane.xlu0 %1067 }
 0x954   :  { %vm1072_vm12 = vcmp.ge.f32.partialorder %v1056_v63, %v1068_v9  ;;  %v1065_v10 = vpop.xlane.xlu1 %1064 }
 0x955   :  { %v1076_v11 = vsel %vm1072_vm12, -1e+30, %v1056_v63  ;;  %vm1071_vm13 = vcmp.ge.f32.partialorder %v1055_v0, %v1065_v10 }
 0x956   :  { %v1075_v12 = vsel %vm1071_vm13, -1e+30, %v1055_v0  ;;  %v1086_v13 = vsel %vm1016_vm1, %v1076_v11, -inf }
 0x957   :  { %1087 = vmax.xlane.f32.xlu0 %v1086_v13  ;;  %v1083_v14 = vsel %vm1016_vm1, %v1075_v12, -inf }
 0x958   :  { %1084 = vmax.xlane.f32.xlu1 %v1083_v14 }
 0x9dc   :  { %v1082_v15 = vpop.xlane.xlu0 %1081 }
 0x9dd   :  { %vm1090_vm14 = vcmp.ge.f32.partialorder %v1074_v5, %v1082_v15  ;;  %v1079_v16 = vpop.xlane.xlu1 %1078 }
 0x9de   :  { %v1094_v17 = vsel %vm1090_vm14, -1e+30, %v1074_v5  ;;  %vm1089_vm15 = vcmp.ge.f32.partialorder %v1073_v6, %v1079_v16 }
 0x9df   :  { %v1093_v18 = vsel %vm1089_vm15, -1e+30, %v1073_v6  ;;  %v1100_v19 = vsel %vm1016_vm1, %v1094_v17, -inf }
 0x9e0   :  { %1101 = vmax.xlane.f32.xlu0 %v1100_v19  ;;  %v1097_v20 = vsel %vm1016_vm1, %v1093_v18, -inf }
 0x9e1   :  { %1098 = vmax.xlane.f32.xlu1 %v1097_v20 }
 0x9e4   :  { %v1088_v23 = vpop.xlane.xlu0 %1087 }
 0x9e5   :  { %vm1092_vm0 = vcmp.ge.f32.partialorder %v1076_v11, %v1088_v23  ;;  %v1085_v24 = vpop.xlane.xlu1 %1084 }
 0x9e6   :  { %v1096_v26 = vsel %vm1092_vm0, -1e+30, %v1076_v11  ;;  %vm1091_vm2 = vcmp.ge.f32.partialorder %v1075_v12, %v1085_v24 }
 0x9e7   :  { %v1095_v28 = vsel %vm1091_vm2, -1e+30, %v1075_v12  ;;  %v1106_v29 = vsel %vm1016_vm1, %v1096_v26, -inf }
 0x9e8   :  { %1107 = vmax.xlane.f32.xlu0 %v1106_v29  ;;  %v1103_v31 = vsel %vm1016_vm1, %v1095_v28, -inf }
 0x9e9   :  { %1104 = vmax.xlane.f32.xlu1 %v1103_v31 }
 0xa6d   :  { %v1102_v32 = vpop.xlane.xlu0 %1101 }
 0xa6e   :  { %vm1110_vm3 = vcmp.ge.f32.partialorder %v1094_v17, %v1102_v32  ;;  %v1099_v33 = vpop.xlane.xlu1 %1098 }
 0xa6f   :  { %v1114_v25 = vsel %vm1110_vm3, -1e+30, %v1094_v17  ;;  %vm1109_vm4 = vcmp.ge.f32.partialorder %v1093_v18, %v1099_v33 }
 0xa70   :  { %v1113_v22 = vsel %vm1109_vm4, -1e+30, %v1093_v18  ;;  %v1120_v27 = vsel %vm1016_vm1, %v1114_v25, -inf }
 0xa71   :  { %1121 = vmax.xlane.f32.xlu0 %v1120_v27  ;;  %v1117_v35 = vsel %vm1016_vm1, %v1113_v22, -inf }
 0xa72   :  { %1118 = vmax.xlane.f32.xlu1 %v1117_v35 }
 0xa75   :  { %v1108_v30 = vpop.xlane.xlu0 %1107 }
 0xa76   :  { %vm1112_vm5 = vcmp.ge.f32.partialorder %v1096_v26, %v1108_v30  ;;  %v1105_v21 = vpop.xlane.xlu1 %1104 }
 0xa77   :  { %v1116_v37 = vsel %vm1112_vm5, -1e+30, %v1096_v26  ;;  %vm1111_vm6 = vcmp.ge.f32.partialorder %v1095_v28, %v1105_v21 }
 0xa78   :  { %v1115_v39 = vsel %vm1111_vm6, -1e+30, %v1095_v28  ;;  %v1126_v41 = vsel %vm1016_vm1, %v1116_v37, -inf }
 0xa79   :  { %1127 = vmax.xlane.f32.xlu0 %v1126_v41  ;;  %v1123_v42 = vsel %vm1016_vm1, %v1115_v39, -inf }
 0xa7a   :  { %1124 = vmax.xlane.f32.xlu1 %v1123_v42 }
 0xafe   :  { %v1122_v43 = vpop.xlane.xlu0 %1121 }
 0xaff   :  { %vm1130_vm7 = vcmp.ge.f32.partialorder %v1114_v25, %v1122_v43  ;;  %v1119_v44 = vpop.xlane.xlu1 %1118 }
 0xb00   :  { %v1134_v45 = vsel %vm1130_vm7, -1e+30, %v1114_v25  ;;  %vm1129_vm8 = vcmp.ge.f32.partialorder %v1113_v22, %v1119_v44 }
 0xb01   :  { %v1133_v46 = vsel %vm1129_vm8, -1e+30, %v1113_v22  ;;  %v1140_v47 = vsel %vm1016_vm1, %v1134_v45, -inf }
 0xb02   :  { %1141 = vmax.xlane.f32.xlu0 %v1140_v47  ;;  %v1137_v48 = vsel %vm1016_vm1, %v1133_v46, -inf }
 0xb03   :  { %1138 = vmax.xlane.f32.xlu1 %v1137_v48 }
 0xb06   :  { %v1128_v49 = vpop.xlane.xlu0 %1127 }
 0xb07   :  { %vm1132_vm9 = vcmp.ge.f32.partialorder %v1116_v37, %v1128_v49  ;;  %v1125_v50 = vpop.xlane.xlu1 %1124 }
 0xb08   :  { %v1136_v51 = vsel %vm1132_vm9, -1e+30, %v1116_v37  ;;  %vm1131_vm10 = vcmp.ge.f32.partialorder %v1115_v39, %v1125_v50 }
 0xb09   :  { %v1135_v52 = vsel %vm1131_vm10, -1e+30, %v1115_v39  ;;  %v1146_v53 = vsel %vm1016_vm1, %v1136_v51, -inf }
 0xb0a   :  { %1147 = vmax.xlane.f32.xlu0 %v1146_v53  ;;  %v1143_v54 = vsel %vm1016_vm1, %v1135_v52, -inf }
 0xb0b   :  { %1144 = vmax.xlane.f32.xlu1 %v1143_v54 }
 0xb8f   :  { %v1142_v55 = vpop.xlane.xlu0 %1141 }
 0xb90   :  { %vm1150_vm11 = vcmp.ge.f32.partialorder %v1134_v45, %v1142_v55  ;;  %v1139_v56 = vpop.xlane.xlu1 %1138 }
 0xb91   :  { %vm1149_vm12 = vcmp.ge.f32.partialorder %v1133_v46, %v1139_v56  ;;  %v1154_v57 = vsel %vm1150_vm11, -1e+30, %v1134_v45 }
 0xb92   :  { %v1160_v58 = vsel %vm1016_vm1, %v1154_v57, -inf  ;;  %v1153_v59 = vsel %vm1149_vm12, -1e+30, %v1133_v46 }
 0xb93   :  { %1161 = vmax.xlane.f32.xlu0 %v1160_v58  ;;  %v1157_v60 = vsel %vm1016_vm1, %v1153_v59, -inf }
 0xb94   :  { %1158 = vmax.xlane.f32.xlu1 %v1157_v60 }
 0xb97   :  { %v1148_v61 = vpop.xlane.xlu0 %1147 }
 0xb98   :  { %vm1152_vm13 = vcmp.ge.f32.partialorder %v1136_v51, %v1148_v61  ;;  %v1145_v62 = vpop.xlane.xlu1 %1144 }
 0xb99   :  { %vm1151_vm14 = vcmp.ge.f32.partialorder %v1135_v52, %v1145_v62  ;;  %v1156_v63 = vsel %vm1152_vm13, -1e+30, %v1136_v51 }
 0xb9a   :  { %v1166_v0 = vsel %vm1016_vm1, %v1156_v63, -inf  ;;  %v1155_v1 = vsel %vm1151_vm14, -1e+30, %v1135_v52 }
 0xb9b   :  { %1167 = vmax.xlane.f32.xlu0 %v1166_v0  ;;  %v1163_v2 = vsel %vm1016_vm1, %v1155_v1, -inf }
 0xb9c   :  { %1164 = vmax.xlane.f32.xlu1 %v1163_v2 }
 0xc20   :  { %v1162_v3 = vpop.xlane.xlu0 %1161 }
 0xc21   :  { %vm1170_vm15 = vcmp.ge.f32.partialorder %v1797_v34, %v1162_v3  ;;  %v1159_v4 = vpop.xlane.xlu1 %1158 }
 0xc22   :  { %vm1169_vm0 = vcmp.ge.f32.partialorder %v1799_v36, %v1159_v4  ;;  %v1174_v5 = vsel %vm1170_vm15, %v1797_v34, 0.0 }
 0xc23   :  { %v1180_v6 = vsel %vm1016_vm1, %v1174_v5, -inf  ;;  %v1173_v7 = vsel %vm1169_vm0, %v1799_v36, 0.0 }
 0xc24   :  { %1181 = vmax.xlane.f32.xlu0 %v1180_v6  ;;  %v1177_v8 = vsel %vm1016_vm1, %v1173_v7, -inf }
 0xc25   :  { %1178 = vmax.xlane.f32.xlu1 %v1177_v8 }
 0xc28   :  { %v1168_v9 = vpop.xlane.xlu0 %1167 }
 0xc29   :  { %vm1172_vm2 = vcmp.ge.f32.partialorder %v1805_v38, %v1168_v9  ;;  %v1165_v10 = vpop.xlane.xlu1 %1164 }
 0xc2a   :  { %vm1171_vm3 = vcmp.ge.f32.partialorder %v1807_v40, %v1165_v10  ;;  %v1176_v11 = vsel %vm1172_vm2, %v1805_v38, 0.0 }
 0xc2b   :  { %v1186_v12 = vsel %vm1016_vm1, %v1176_v11, -inf  ;;  %v1175_v34 = vsel %vm1171_vm3, %v1807_v40, 0.0 }
 0xc2c   :  { %1187 = vmax.xlane.f32.xlu0 %v1186_v12  ;;  %v1183_v13 = vsel %vm1016_vm1, %v1175_v34, -inf }
 0xc2d   :  { %1184 = vmax.xlane.f32.xlu1 %v1183_v13 }
 0xcb1   :  { %v1182_v36 = vpop.xlane.xlu0 %1181 }
 0xcb2   :  { %v1190_v14 = vsub.f32 %v1174_v5, %v1182_v36  ;;  %v1179_v15 = vpop.xlane.xlu1 %1178 }
 0xcb3   :  { %v1189_v16 = vsub.f32 %v1173_v7, %v1179_v15 }
 0xcb4   :  { %v1195_v17 = vmul.f32 1.442695, %v1190_v14 }
 0xcb5   :  { %v1193_v18 = vmul.f32 1.442695, %v1189_v16 }
 0xcb6   :  { %1512 = vpow2.f32 %v1195_v17 }
 0xcb7   :  { %1514 = vpow2.f32 %v1193_v18 }
 0xcb9   :  { %v1188_v19 = vpop.xlane.xlu0 %1187 }
 0xcba   :  { %v1192_v20 = vsub.f32 %v1176_v11, %v1188_v19  ;;  %v1185_v23 = vpop.xlane.xlu1 %1184 }
 0xcbb   :  { %v1191_v38 = vsub.f32 %v1175_v34, %v1185_v23 }
 0xcbc   :  { %v1199_v24 = vmul.f32 1.442695, %v1192_v20 }
 0xcbd   :  { %v1197_v26 = vmul.f32 1.442695, %v1191_v38 }
 0xcbe   :  { %1516 = vpow2.f32 %v1199_v24 }
 0xcbf   :  { %1518 = vpow2.f32 %v1197_v26 }
 0xcc0   :  { %v1513_v40 = vpop.eup %1512 }
 0xcc1   :  { %v1515_v28 = vpop.eup %1514  ;;  %v1204_v29 = vsel %vm1016_vm1, %v1513_v40, 0.0 }
 0xcc2   :  { %1205 = vadd.xlane.f32.xlu0 %v1204_v29  ;;  %v1201_v31 = vsel %vm1016_vm1, %v1515_v28, 0.0 }
 0xcc3   :  { %1202 = vadd.xlane.f32.xlu1 %v1201_v31 }
 0xcc8   :  { %v1517_v32 = vpop.eup %1516 }
 0xcc9   :  { %v1519_v33 = vpop.eup %1518  ;;  %v1210_v25 = vsel %vm1016_vm1, %v1517_v32, 0.0 }
 0xcca   :  { %1211 = vadd.xlane.f32.xlu0 %v1210_v25  ;;  %v1207_v22 = vsel %vm1016_vm1, %v1519_v33, 0.0 }
 0xccb   :  { %1208 = vadd.xlane.f32.xlu1 %v1207_v22 }
 0xd4f   :  { %v1206_v27 = vpop.xlane.xlu0 %1205 }
 0xd50   :  { %1520 = vrcp.f32 %v1206_v27  ;;  %v1203_v35 = vpop.xlane.xlu1 %1202 }
 0xd51   :  { %1522 = vrcp.f32 %v1203_v35 }
 0xd57   :  { %v1212_v30 = vpop.xlane.xlu0 %1211 }
 0xd58   :  { %1524 = vrcp.f32 %v1212_v30  ;;  %v1209_v21 = vpop.xlane.xlu1 %1208 }
 0xd59   :  { %1526 = vrcp.f32 %v1209_v21 }
 0xd5a   :  { %v1521_v37 = vpop.eup %1520 }
 0xd5b   :  { %v1523_v39 = vpop.eup %1522  ;;  %v1218_v41 = vmul.f32 %v1521_v37, %v1513_v40 }
 0xd5c   :  { %v1217_v42 = vmul.f32 %v1523_v39, %v1515_v28 }
 0xd5d   :  { %1222 = vst.msk [vmem:[#allocation2 + $0x8] sm:$0xff] %vm1016_vm1, %v1218_v41 }
 0xd5e   :  { %1221 = vst.msk [vmem:[#allocation2] sm:$0xff] %vm1016_vm1, %v1217_v42 }
 0xd62   :  { %v1525_v43 = vpop.eup %1524 }
 0xd63   :  { %v1527_v44 = vpop.eup %1526  ;;  %v1220_v45 = vmul.f32 %v1525_v43, %v1517_v32 }
 0xd64   :  { %v1219_v46 = vmul.f32 %v1527_v44, %v1519_v33 }
 0xd65   :  { %1224 = vst.msk [vmem:[#allocation2 + $0x18] sm:$0xff] %vm1016_vm1, %v1220_v45 }
 0xd66   :  { %1223 = vst.msk [vmem:[#allocation2 + $0x10] sm:$0xff] %vm1016_vm1, %v1219_v46 }
 0xd67   :  { %1539 = shalt.err (!%p1536_p4)
}
 0xd68   :  { %s1540_s27 = scalar_lea.hbm %s1890_s9, 512 }
 0xd69   :  { %p1541_p5 = scmp.ne.s32.totalorder %s1890_s9, %s1540_s27  ;;  %p1544_p6 = scmp.lt.u32.totalorder %s1540_s27, %s1890_s9 }
 0xd6b   :  { %p1546_p7 = pnand %p1544_p6, %p1541_p5 }
 0xd6d   :  { %1549 = shalt.err (!%p1546_p7)
}
 0xd6e   :  { %s1555_s10 = smov 128   ;;  %s1556_s11 = smov 8  }
 0xd6f   :  { %1236 = dma.vmem_to_hbm [thread:$0]  %s1231_s8, 512, %s1890_s9, [#allocation3], %s1555_s10, %s1555_s10, %s1556_s11  }
 0xd70   :  { %1550 = dma.done.wait [#allocation3], 512  }
 0xd71   :  { %1551 = vsyncadd [#allocation3], 4294966784 }
 0xd72   :  { %1240 = vsyncpa [#allocation3], 1 }

</bundles_post_ra>
